<compile_context>
chip_gen: v7x
topology: tpu7x:2x2x1
jax: 0.10.0
libtpu: 0.0.40
codegen_flags: <defaults>
</compile_context>

<pallas_src>
import jax
import jax.numpy as jnp
from jax.experimental import pallas as pl
from jax.experimental.pallas import tpu as pltpu


# ---------------------------------------------------------------------------
# Zero-copy path (primary): output HBM buffer IS the input HBM buffer.
# ---------------------------------------------------------------------------
def _alias_passthrough_kernel(x_ref, o_ref):
    # Output is aliased onto the input, so the bytes are already in place.
    # touch() pins a read+write dependency on the aliased output ref without
    # generating any DMA, load or store.
    del x_ref
    pltpu.touch(o_ref)


def _forward_zero_copy(x: jax.Array) -> jax.Array:
    return pl.pallas_call(
        _alias_passthrough_kernel,
        out_shape=jax.ShapeDtypeStruct(x.shape, x.dtype),
        in_specs=[pl.BlockSpec(memory_space=pl.ANY)],   # stay in HBM, no auto-DMA
        out_specs=pl.BlockSpec(memory_space=pl.ANY),
        input_output_aliases={0: 0},                    # output buffer == input buffer
        cost_estimate=pl.CostEstimate(
            flops=0, transcendentals=0, bytes_accessed=0),
    )(x)


# ---------------------------------------------------------------------------
# Fallback path: a single whole-array HBM->HBM DMA (no VMEM transit, no tiled
# pipeline).  Only used if the zero-copy path fails to lower on this runtime.
# ---------------------------------------------------------------------------
def _hbm_dma_copy_kernel(x_hbm, o_hbm, sem):
    cp = pltpu.make_async_copy(x_hbm, o_hbm, sem)
    cp.start()
    cp.wait()


def _forward_hbm_dma(x: jax.Array) -> jax.Array:
    nbytes = int(x.size) * jnp.dtype(x.dtype).itemsize
    return pl.pallas_call(
        _hbm_dma_copy_kernel,
        out_shape=jax.ShapeDtypeStruct(x.shape, x.dtype),
        in_specs=[pl.BlockSpec(memory_space=pl.ANY)],
        out_specs=pl.BlockSpec(memory_space=pl.ANY),
        scratch_shapes=[pltpu.SemaphoreType.DMA(())],
        cost_estimate=pl.CostEstimate(
            flops=0, transcendentals=0, bytes_accessed=2 * nbytes),
    )(x)


def base_model_forward(x: jax.Array) -> jax.Array:
    """Identity forward for the abstract BaseModel, run through a Pallas kernel.

    Accepts any-shaped array (e.g. NCHW). Returns an array with the same shape
    and dtype.  Callers that donate `x` (jax.jit(..., donate_argnums=0)) get a
    true zero-copy pass-through; otherwise XLA inserts one defensive copy to
    satisfy the alias, which is still strictly cheaper than the old tiled
    VMEM round-trip.
    """
    try:
        return _forward_zero_copy(x)
    except Exception:  # lowering fallback only; correctness is identical
        return _forward_hbm_dma(x)


if __name__ == "__main__":
    key = jax.random.PRNGKey(0)
    # Small NCHW input consistent with a typical conv-style model input.
    x = jax.random.normal(key, (2, 4, 16, 16), dtype=jnp.float32)

    y = base_model_forward(x)
    jax.block_until_ready(y)

    assert y.shape == x.shape and y.dtype == x.dtype
    assert bool(jnp.allclose(y, x)), "identity pass-through mismatch"
    print("KERNEL_OK")
</pallas_src>

<mosaic_0001>
module attributes {stable_mosaic.version = 11 : i64} {
  func.func @_alias_passthrough_kernel(%arg0: memref<2x4x16x16xf32, #tpu.memory_space<any>>, %arg1: memref<2x4x16x16xf32, #tpu.memory_space<any>>) attributes {dimension_semantics = [], scalar_prefetch = 0 : i64, scratch_operands = 0 : i64, tpu.core_type = #tpu.core_type<tc>} {
    return
  }
}

module attributes {stable_mosaic.version = 11 : i64} {
  func.func @_hbm_dma_copy_kernel(%arg0: memref<2x4x16x16xf32, #tpu.memory_space<any>>, %arg1: memref<2x4x16x16xf32, #tpu.memory_space<any>>, %arg2: memref<!tpu.dma_semaphore, #tpu.memory_space<semaphore_mem>>) attributes {dimension_semantics = [], scalar_prefetch = 0 : i64, scratch_operands = 1 : i64, tpu.core_type = #tpu.core_type<tc>} {
    tpu.enqueue_dma source(%arg0 : memref<2x4x16x16xf32, #tpu.memory_space<any>>) target(%arg1 : memref<2x4x16x16xf32, #tpu.memory_space<any>>) target_semaphore(%arg2 : memref<!tpu.dma_semaphore, #tpu.memory_space<semaphore_mem>>)
    tpu.wait_dma2 semaphore(%arg2 : memref<!tpu.dma_semaphore, #tpu.memory_space<semaphore_mem>>) src(%arg0 : memref<2x4x16x16xf32, #tpu.memory_space<any>>) dst(%arg1 : memref<2x4x16x16xf32, #tpu.memory_space<any>>)
    return
  }
}

</mosaic_0001>

<bundles_post_ra>
// kernel: tpu_custom_call.1
= control target key start
LH: loop header
LB: loop body
LE: loop exit
PB: predicated region body
PF: predicated region fallthrough
CT: control target
= control target key end

     0   :  { %s16_s0 = inlined_call_operand.hbm [shape: f32[2,4,16,16], index: 0, kind: input, shape index: {}, may-alias: {0,1}]   ;;  %s17_s1 = inlined_call_operand.hbm [shape: f32[2,4,16,16], index: 1, kind: output, shape index: {}, may-alias: {0,1}]  }

// kernel: tpu_custom_call.1
= control target key start
LH: loop header
LB: loop body
LE: loop exit
PB: predicated region body
PF: predicated region fallthrough
CT: control target
= control target key end

     0   :  { %s36_s6 = smov [#allocation2]   ;;  %s37_s7 = smov [#allocation3]   ;;  %s55_s0 = inlined_call_operand.hbm [shape: f32[2,4,16,16], index: 0, kind: input, shape index: {}]   ;;  %s56_s1 = inlined_call_operand.hbm [shape: f32[2,4,16,16], index: 1, kind: output, shape index: {}]  }
   0x1   :  { %s38_s8 = smov 0  }
   0x2   :  { %18 = dma.general %s55_s0, 2048, %s56_s1, %s36_s6, %s37_s7, [#allocation4], %s38_s8, 0  }
   0x3   :  { %34 = dma.done.wait [#allocation2], 2048 }
   0x4   :  { %35 = vsyncadd [#allocation2], 4294965248 }
   0x5   :  { %24 = vsyncmov [#allocation2] }
   0x8   :  { %s25_s13 = vpop.sfrf %24 }
   0x9   :  { %p30_p0 = scmp.ne.s32.totalorder %s25_s13, 0 }
   0xb   :  { %29 = shalt.err (%p30_p0)  }

</bundles_post_ra>
